<compile_context>
chip_gen: v7x
topology: tpu7x:2x2x1
jax: 0.10.0
libtpu: 0.0.40
codegen_flags: <defaults>
</compile_context>

<pallas_src>
import functools

import jax
import jax.numpy as jnp
from jax import lax
from jax.experimental import pallas as pl
from jax.experimental.pallas import tpu as pltpu

LANES = 128
SUBLANES = 8
CHUNK = SUBLANES * LANES            # 1024 elements = one (8,128) f32 vreg

# Rows streamed per inner fori_loop iteration: (64,128) f32 = 8 vregs per
# operand, so p / t / p*t / p+t plus both (8,128) accumulators fit in the
# 64-entry vreg file -> no VMEM materialization of elementwise temporaries.
STREAM_ROWS = 64

# Per-grid-step tile height (rows of 128 lanes).
TARGET_BLOCK_ROWS = 8192            # 4 MiB f32/tile -> 16 MiB double-buffered
TARGET_BLOCK_ROWS_V7X = 16384       # 8 MiB f32/tile -> 32 MiB (< 64 MiB physical)


def _is_v7x():
    try:
        kind = jax.devices()[0].device_kind.lower()
    except Exception:
        return False
    return "v7" in kind


def _reduce_rows(x):
    """(R,128) -> (8,128) by summing row groups; pure vreg-wise VPU adds."""
    r = x.shape[0]
    return x.reshape(r // SUBLANES, SUBLANES, LANES).sum(axis=0)


def _dice_partial_kernel(p_ref, t_ref, pt_out, s_out, *, rows, row_block,
                         steps_per_core, needs_mask):
    """Per-core vector partial sums.

    p_ref, t_ref : (row_block, 128) input tiles (natural dtype, cast here)
    pt_out       : (1, 8, 128) running vector sum of p * t   (per-core resident)
    s_out        : (1, 8, 128) running vector sum of p + t   (per-core resident)
    """
    c = pl.program_id(0)            # core / parallel axis
    i = pl.program_id(1)            # reduction / arbitrary axis

    @pl.when(i == 0)
    def _init():
        pt_out[...] = jnp.zeros_like(pt_out)
        s_out[...] = jnp.zeros_like(s_out)

    blk = c * steps_per_core + i    # logical (unclamped) block id
    row0 = blk * row_block

    def accumulate(apply_mask):
        if row_block > STREAM_ROWS and row_block % STREAM_ROWS == 0:
            # Stream the tile in vreg-sized sub-chunks; accumulators live in
            # the fori_loop carry (registers), not VMEM.
            def body(j, carry):
                acc_pt, acc_s = carry
                r0 = pl.multiple_of(j * STREAM_ROWS, STREAM_ROWS)
                p = p_ref[pl.ds(r0, STREAM_ROWS), :].astype(jnp.float32)
                t = t_ref[pl.ds(r0, STREAM_ROWS), :].astype(jnp.float32)
                pt = p * t
                s = p + t
                if apply_mask:
                    local = lax.broadcasted_iota(jnp.int32, (STREAM_ROWS, 1), 0)
                    valid = (row0 + r0 + local) < rows
                    pt = jnp.where(valid, pt, 0.0)
                    s = jnp.where(valid, s, 0.0)
                return acc_pt + _reduce_rows(pt), acc_s + _reduce_rows(s)

            zero = jnp.zeros((SUBLANES, LANES), jnp.float32)
            acc_pt, acc_s = lax.fori_loop(0, row_block // STREAM_ROWS, body,
                                          (zero, zero))
        else:
            # Tiny blocks (only for small inputs): whole-tile path.
            p = p_ref[...].astype(jnp.float32)
            t = t_ref[...].astype(jnp.float32)
            pt = p * t
            s = p + t
            if apply_mask:
                local = lax.broadcasted_iota(jnp.int32, (row_block, 1), 0)
                valid = (row0 + local) < rows
                pt = jnp.where(valid, pt, 0.0)
                s = jnp.where(valid, s, 0.0)
            acc_pt, acc_s = _reduce_rows(pt), _reduce_rows(s)

        pt_out[0] += acc_pt
        s_out[0] += acc_s

    if not needs_mask:
        accumulate(False)
    else:
        # Only the ragged last block (or a fully over-covered, clamped block)
        # pays for the iota/compare/select; all interior blocks take the
        # unmasked fast path at runtime.
        pl.when(row0 + row_block <= rows)(lambda: accumulate(False))
        pl.when(row0 + row_block > rows)(lambda: accumulate(True))


def _run_partials(p2, t2, rows, row_block, num_cores, core_parallel):
    total_blocks = pl.cdiv(rows, row_block)
    steps_per_core = pl.cdiv(total_blocks, num_cores)
    # Any partial last block or over-covered (clamped) block needs masking.
    needs_mask = num_cores * steps_per_core * row_block != rows

    def in_map(c, i):
        blk = c * steps_per_core + i
        # Clamp over-coverage blocks onto a valid tile (their logical row range
        # is >= rows, so the kernel masks them to zero).
        return (jnp.minimum(blk, total_blocks - 1), 0)

    kernel = functools.partial(
        _dice_partial_kernel, rows=rows, row_block=row_block,
        steps_per_core=steps_per_core, needs_mask=needs_mask)

    itemsize = max(p2.dtype.itemsize, t2.dtype.itemsize)
    per_tile = row_block * LANES * itemsize
    # 2 inputs x 2 pipeline buffers + headroom; clamp so it is legal on every
    # generation (v7x physical VMEM is only 64 MiB).
    vmem_limit = int(min(48 << 20, max(32 << 20, 4 * per_tile + (4 << 20))))

    if num_cores > 1:
        dims = (core_parallel, "arbitrary")
    else:
        dims = ("arbitrary", "arbitrary")

    out_sds = jax.ShapeDtypeStruct((num_cores, SUBLANES, LANES), jnp.float32)
    # TODO(synk): on v7x, sweep pipeline_mode=pl.Buffered(3) on the input specs
    # once a trace shows DMA-issue bubbles at step boundaries.
    return pl.pallas_call(
        kernel,
        out_shape=(out_sds, out_sds),
        grid_spec=pltpu.PrefetchScalarGridSpec(
            num_scalar_prefetch=0,
            grid=(num_cores, steps_per_core),
            in_specs=[
                pl.BlockSpec((row_block, LANES), in_map),
                pl.BlockSpec((row_block, LANES), in_map),
            ],
            # Per-core output blocks, resident across the reduction axis.
            out_specs=[
                pl.BlockSpec((1, SUBLANES, LANES), lambda c, i: (c, 0, 0)),
                pl.BlockSpec((1, SUBLANES, LANES), lambda c, i: (c, 0, 0)),
            ],
        ),
        compiler_params=pltpu.CompilerParams(
            dimension_semantics=dims,
            vmem_limit_bytes=vmem_limit,
        ),
    )(p2, t2)


def dice_loss(pred, target, smooth=1e-5):
    assert pred.shape == target.shape
    n = pred.size

    p_flat = pred.reshape(-1)
    t_flat = target.reshape(-1)

    # (8*128)-aligned body goes through the Pallas kernel (reshape is free when
    # n is already aligned, which is the common case); the <=1023-element tail
    # is reduced directly here -- no full-array jnp.pad copy.
    n_body = (n // CHUNK) * CHUNK

    inter = jnp.float32(0.0)
    total = jnp.float32(0.0)

    if n_body > 0:
        p_body = p_flat if n_body == n else p_flat[:n_body]
        t_body = t_flat if n_body == n else t_flat[:n_body]
        rows = n_body // LANES                       # multiple of 8
        p2 = p_body.reshape(rows, LANES)
        t2 = t_body.reshape(rows, LANES)

        is_v7x = _is_v7x()
        target_rows = TARGET_BLOCK_ROWS_V7X if is_v7x else TARGET_BLOCK_ROWS
        if rows >= target_rows:
            row_block = target_rows
        elif rows >= STREAM_ROWS:
            row_block = (rows // STREAM_ROWS) * STREAM_ROWS
        else:
            row_block = rows                         # tiny input, multiple of 8

        total_blocks = pl.cdiv(rows, row_block)
        # Only shard across TensorCores where there actually are two of them.
        num_cores = 2 if (is_v7x and total_blocks >= 2) else 1
        core_parallel = getattr(pltpu, "CORE_PARALLEL", "parallel")

        try:
            pt_parts, s_parts = _run_partials(p2, t2, rows, row_block,
                                              num_cores, core_parallel)
        except Exception:
            if num_cores == 1:
                raise
            # Defensive fallback if the core-parallel path is unsupported.
            pt_parts, s_parts = _run_partials(p2, t2, rows, row_block, 1,
                                              core_parallel)

        inter = inter + jnp.sum(pt_parts)
        total = total + jnp.sum(s_parts)

    if n_body != n:
        p_tail = p_flat[n_body:].astype(jnp.float32)
        t_tail = t_flat[n_body:].astype(jnp.float32)
        inter = inter + jnp.sum(p_tail * t_tail)
        total = total + jnp.sum(p_tail) + jnp.sum(t_tail)

    dice = (2.0 * inter + smooth) / (total + smooth)
    return 1.0 - dice


def dice_loss_ref(pred, target, smooth=1e-5):
    p = pred.reshape(-1).astype(jnp.float32)
    t = target.reshape(-1).astype(jnp.float32)
    intersection = jnp.sum(p * t)
    return 1.0 - (2.0 * intersection + smooth) / (jnp.sum(p) + jnp.sum(t) + smooth)


if __name__ == "__main__":
    key = jax.random.PRNGKey(0)
    k1, k2, k3, k4, k5, k6 = jax.random.split(key, 6)

    # Segmentation-style inputs: (batch=2, channels=4, 16, 16).
    pred = jax.nn.sigmoid(jax.random.normal(k1, (2, 4, 16, 16), dtype=jnp.float32))
    target = (jax.random.uniform(k2, (2, 4, 16, 16)) > 0.5).astype(jnp.float32)
    loss = jax.block_until_ready(dice_loss(pred, target))
    ref = jax.block_until_ready(dice_loss_ref(pred, target))
    assert jnp.allclose(loss, ref, atol=1e-5, rtol=1e-4), (loss, ref)

    # Ragged shape (exercises the XLA tail path) and a non-default smooth.
    pred2 = jax.nn.sigmoid(jax.random.normal(k3, (3, 5, 17, 13), dtype=jnp.float32))
    target2 = (jax.random.uniform(k4, (3, 5, 17, 13)) > 0.5).astype(jnp.float32)
    loss2 = jax.block_until_ready(dice_loss(pred2, target2, smooth=1.0))
    ref2 = jax.block_until_ready(dice_loss_ref(pred2, target2, smooth=1.0))
    assert jnp.allclose(loss2, ref2, atol=1e-5, rtol=1e-4), (loss2, ref2)

    # Multi-block shape: exercises the streaming fori_loop accumulation, the
    # cross-step accumulator residency, and the predicated edge-block mask.
    pred3 = jax.nn.sigmoid(jax.random.normal(k5, (2, 4, 384, 384), dtype=jnp.float32))
    target3 = (jax.random.uniform(k6, (2, 4, 384, 384)) > 0.5).astype(jnp.float32)
    loss3 = jax.block_until_ready(dice_loss(pred3, target3))
    ref3 = jax.block_until_ready(dice_loss_ref(pred3, target3))
    assert jnp.allclose(loss3, ref3, atol=1e-5, rtol=1e-4), (loss3, ref3)

    print("KERNEL_OK")
</pallas_src>

<mosaic_0001>
module attributes {stable_mosaic.version = 11 : i64} {
  func.func @_dice_partial_kernel(%arg0: i32, %arg1: i32, %arg2: memref<16x128xf32, #tpu.memory_space<vmem>>, %arg3: memref<16x128xf32, #tpu.memory_space<vmem>>, %arg4: memref<1x8x128xf32, #tpu.memory_space<vmem>>, %arg5: memref<1x8x128xf32, #tpu.memory_space<vmem>>) attributes {dimension_semantics = [#tpu.dimension_semantics<arbitrary>, #tpu.dimension_semantics<arbitrary>], iteration_bounds = array<i64: 1, 1>, scalar_prefetch = 0 : i64, scratch_operands = 0 : i64, tpu.core_type = #tpu.core_type<tc>, window_params = [{transform_indices = @transform_0, window_bounds = array<i64: 16, 128>}, {transform_indices = @transform_1, window_bounds = array<i64: 16, 128>}, {transform_indices = @transform_2, window_bounds = array<i64: 1, 8, 128>}, {transform_indices = @transform_3, window_bounds = array<i64: 1, 8, 128>}]} {
    %c0_i32 = arith.constant 0 : i32
    %0 = arith.cmpi eq, %arg1, %c0_i32 : i32
    %1 = arith.extui %0 : i1 to i32
    %c0_i32_0 = arith.constant 0 : i32
    %2 = arith.cmpi ne, %1, %c0_i32_0 : i32
    scf.if %2 {
      %cst_17 = arith.constant 0.000000e+00 : f32
      %23 = vector.broadcast %cst_17 : f32 to vector<1x8x128xf32>
      %c0_18 = arith.constant 0 : index
      %c0_19 = arith.constant 0 : index
      %c0_20 = arith.constant 0 : index
      %24 = vector.load %arg4[%c0_18, %c0_19, %c0_20] : memref<1x8x128xf32, #tpu.memory_space<vmem>>, vector<1x8x128xf32>
      tpu.vector_store %arg4[%c0_18, %c0_19, %c0_20], %23 {strides = array<i32>} : memref<1x8x128xf32, #tpu.memory_space<vmem>>, vector<1x8x128xf32>,
      %cst_21 = arith.constant 0.000000e+00 : f32
      %25 = vector.broadcast %cst_21 : f32 to vector<1x8x128xf32>
      %c0_22 = arith.constant 0 : index
      %c0_23 = arith.constant 0 : index
      %c0_24 = arith.constant 0 : index
      %26 = vector.load %arg5[%c0_22, %c0_23, %c0_24] : memref<1x8x128xf32, #tpu.memory_space<vmem>>, vector<1x8x128xf32>
      tpu.vector_store %arg5[%c0_22, %c0_23, %c0_24], %25 {strides = array<i32>} : memref<1x8x128xf32, #tpu.memory_space<vmem>>, vector<1x8x128xf32>,
    } else {
    }
    %c0 = arith.constant 0 : index
    %c0_1 = arith.constant 0 : index
    %3 = vector.load %arg2[%c0, %c0_1] : memref<16x128xf32, #tpu.memory_space<vmem>>, vector<16x128xf32>
    %c0_2 = arith.constant 0 : index
    %c0_3 = arith.constant 0 : index
    %4 = vector.load %arg3[%c0_2, %c0_3] : memref<16x128xf32, #tpu.memory_space<vmem>>, vector<16x128xf32>
    %5 = arith.mulf %3, %4 : vector<16x128xf32>
    %6 = arith.addf %3, %4 : vector<16x128xf32>
    %7 = vector.shape_cast %5 : vector<16x128xf32> to vector<2x8x128xf32>
    %cst = arith.constant dense<0.000000e+00> : vector<8x128xf32>
    %8 = vector.multi_reduction <add>, %7, %cst [0] : vector<2x8x128xf32> to vector<8x128xf32>
    %9 = vector.shape_cast %6 : vector<16x128xf32> to vector<2x8x128xf32>
    %cst_4 = arith.constant dense<0.000000e+00> : vector<8x128xf32>
    %10 = vector.multi_reduction <add>, %9, %cst_4 [0] : vector<2x8x128xf32> to vector<8x128xf32>
    %c0_5 = arith.constant 0 : index
    %c0_6 = arith.constant 0 : index
    %c0_7 = arith.constant 0 : index
    %11 = vector.load %arg4[%c0_5, %c0_6, %c0_7] : memref<1x8x128xf32, #tpu.memory_space<vmem>>, vector<1x8x128xf32>
    %12 = vector.shape_cast %11 : vector<1x8x128xf32> to vector<8x128xf32>
    %13 = arith.addf %12, %8 : vector<8x128xf32>
    %c0_8 = arith.constant 0 : index
    %c0_9 = arith.constant 0 : index
    %c0_10 = arith.constant 0 : index
    %14 = vector.load %arg4[%c0_8, %c0_9, %c0_10] : memref<1x8x128xf32, #tpu.memory_space<vmem>>, vector<1x8x128xf32>
    %15 = vector.shape_cast %14 : vector<1x8x128xf32> to vector<8x128xf32>
    %16 = vector.shape_cast %13 : vector<8x128xf32> to vector<1x8x128xf32>
    tpu.vector_store %arg4[%c0_8, %c0_9, %c0_10], %16 {strides = array<i32>} : memref<1x8x128xf32, #tpu.memory_space<vmem>>, vector<1x8x128xf32>,
    %c0_11 = arith.constant 0 : index
    %c0_12 = arith.constant 0 : index
    %c0_13 = arith.constant 0 : index
    %17 = vector.load %arg5[%c0_11, %c0_12, %c0_13] : memref<1x8x128xf32, #tpu.memory_space<vmem>>, vector<1x8x128xf32>
    %18 = vector.shape_cast %17 : vector<1x8x128xf32> to vector<8x128xf32>
    %19 = arith.addf %18, %10 : vector<8x128xf32>
    %c0_14 = arith.constant 0 : index
    %c0_15 = arith.constant 0 : index
    %c0_16 = arith.constant 0 : index
    %20 = vector.load %arg5[%c0_14, %c0_15, %c0_16] : memref<1x8x128xf32, #tpu.memory_space<vmem>>, vector<1x8x128xf32>
    %21 = vector.shape_cast %20 : vector<1x8x128xf32> to vector<8x128xf32>
    %22 = vector.shape_cast %19 : vector<8x128xf32> to vector<1x8x128xf32>
    tpu.vector_store %arg5[%c0_14, %c0_15, %c0_16], %22 {strides = array<i32>} : memref<1x8x128xf32, #tpu.memory_space<vmem>>, vector<1x8x128xf32>,
    return
  }
  func.func @transform_0(%arg0: i32, %arg1: i32) -> (i32, i32) {
    %c1_i32 = arith.constant 1 : i32
    %0 = arith.muli %arg0, %c1_i32 : i32
    %1 = arith.addi %0, %arg1 : i32
    %c0_i32 = arith.constant 0 : i32
    %2 = arith.minsi %1, %c0_i32 : i32
    %c0_i32_0 = arith.constant 0 : i32
    %c0_i32_1 = arith.constant 0 : i32
    return %2, %c0_i32_0 : i32, i32
  }
  func.func @transform_1(%arg0: i32, %arg1: i32) -> (i32, i32) {
    %c1_i32 = arith.constant 1 : i32
    %0 = arith.muli %arg0, %c1_i32 : i32
    %1 = arith.addi %0, %arg1 : i32
    %c0_i32 = arith.constant 0 : i32
    %2 = arith.minsi %1, %c0_i32 : i32
    %c0_i32_0 = arith.constant 0 : i32
    %c0_i32_1 = arith.constant 0 : i32
    return %2, %c0_i32_0 : i32, i32
  }
  func.func @transform_2(%arg0: i32, %arg1: i32) -> (i32, i32, i32) {
    %c0_i32 = arith.constant 0 : i32
    %c0_i32_0 = arith.constant 0 : i32
    %c0_i32_1 = arith.constant 0 : i32
    return %arg0, %c0_i32, %c0_i32_0 : i32, i32, i32
  }
  func.func @transform_3(%arg0: i32, %arg1: i32) -> (i32, i32, i32) {
    %c0_i32 = arith.constant 0 : i32
    %c0_i32_0 = arith.constant 0 : i32
    %c0_i32_1 = arith.constant 0 : i32
    return %arg0, %c0_i32, %c0_i32_0 : i32, i32, i32
  }
}

</mosaic_0001>

<bundles_post_ra>
// kernel: tpu_custom_call.1
= control target key start
LH: loop header
LB: loop body
LE: loop exit
PB: predicated region body
PF: predicated region fallthrough
CT: control target
= control target key end

     0   :  { %9 = vsyncpa [#allocation3], 0  ;;  %s296_s0 = inlined_call_operand.hbm [shape: f32[16,128], index: 0, kind: input, shape index: {}]   ;;  %s297_s1 = inlined_call_operand.hbm [shape: f32[16,128], index: 1, kind: input, shape index: {}]   ;;  %s298_s2 = inlined_call_operand.hbm [shape: f32[1,8,128], index: 2, kind: output, shape index: {0}]   ;;  %s299_s3 = inlined_call_operand.hbm [shape: f32[1,8,128], index: 3, kind: output, shape index: {1}]  }
   0x1   :  { %10 = vsyncpa [#allocation6], 0 }
   0x2   :  { %11 = vsyncpa [#allocation4], 0 }
   0x3   :  { %12 = vsyncpa [#allocation9], 0  ;;  %s222_s12 = smov [#allocation2]   ;;  %s126_s16 = scalar_lea.hbm %s296_s0, 256 }
   0x4   :  { %s24_s13 = sshll.u32 %s222_s12, 4  ;;  %p127_p0 = scmp.ne.s32.totalorder %s296_s0, %s126_s16  ;;  %s25_s13 = int_to_ptr.vmem [resolvable:$true] %s24_s13 }
   0x5   :  { %p130_p1 = scmp.lt.u32.totalorder %s126_s16, %s296_s0 }
   0x7   :  { %p132_p2 = pnand %p130_p1, %p127_p0 }
   0x9   :  { %135 = shalt.err (!%p132_p2)
}
   0xa   :  { %s136_s21 = scalar_lea.vmem %s25_s13, 256  ;;  %p141_p4 = scmp.lt.s32.totalorder %s25_s13, %s25_s13 }
   0xb   :  { %p137_p3 = scmp.ne.s32.totalorder %s25_s13, %s136_s21  ;;  %p142_p5 = scmp.lt.s32.totalorder %s136_s21, %s136_s21 }
   0xd   :  { %p143_p6 = por %p142_p5, %p141_p4 }
   0xf   :  { %p144_p7 = pnand %p143_p6, %p137_p3 }
  0x11   :  { %147 = shalt.err (!%p144_p7)
}
  0x12   :  { %s223_s22 = smov 128   ;;  %s224_s23 = smov 8  }
  0x13   :  { %30 = dma.hbm_to_vmem [thread:$0]  %s296_s0, 256, %s25_s13, [#allocation3], %s223_s22, %s223_s22, %s224_s23  }
  0x14   :  { %s225_s26 = smov [#allocation5]   ;;  %s148_s30 = scalar_lea.hbm %s297_s1, 256 }
  0x15   :  { %s42_s27 = sshll.u32 %s225_s26, 4  ;;  %p149_p8 = scmp.ne.s32.totalorder %s297_s1, %s148_s30  ;;  %s43_s27 = int_to_ptr.vmem [resolvable:$true] %s42_s27 }
  0x16   :  { %p152_p9 = scmp.lt.u32.totalorder %s148_s30, %s297_s1 }
  0x18   :  { %p154_p10 = pnand %p152_p9, %p149_p8 }
  0x1a   :  { %157 = shalt.err (!%p154_p10)
}
  0x1b   :  { %s158_s8 = scalar_lea.vmem %s43_s27, 256  ;;  %p163_p12 = scmp.lt.s32.totalorder %s43_s27, %s43_s27 }
  0x1c   :  { %p159_p11 = scmp.ne.s32.totalorder %s43_s27, %s158_s8  ;;  %p164_p13 = scmp.lt.s32.totalorder %s158_s8, %s158_s8 }
  0x1e   :  { %p165_p0 = por %p164_p13, %p163_p12 }
  0x20   :  { %p166_p1 = pnand %p165_p0, %p159_p11 }
  0x22   :  { %169 = shalt.err (!%p166_p1)
}
  0x23   :  { %48 = dma.hbm_to_vmem [thread:$0]  %s297_s1, 256, %s43_s27, [#allocation6], %s223_s22, %s223_s22, %s224_s23  }
  0x24   :  { %214 = dma.done.wait [#allocation3], 256  }
  0x25   :  { %215 = vsyncadd [#allocation3], 4294967040 }
  0x26   :  { %216 = dma.done.wait [#allocation6], 256  }
  0x27   :  { %217 = vsyncadd [#allocation6], 4294967040  ;;  %v69_v0 = vld [vmem:[#allocation2] sm:$0xff]  ;;  %v70_v1 = vld [vmem:[#allocation2 + $0x8] sm:$0xff]  ;;  %s226_s10 = smov [#allocation7]   ;;  %s227_s12 = smov [#allocation8]  }
  0x28   :  { %v71_v2 = vld [vmem:[#allocation5] sm:$0xff]  ;;  %v72_v3 = vld [vmem:[#allocation5 + $0x8] sm:$0xff]  ;;  %s91_s11 = sshll.u32 %s226_s10, 4  ;;  %s101_s13 = sshll.u32 %s227_s12, 4  ;;  %s92_s11 = int_to_ptr.vmem [resolvable:$true] %s91_s11  ;;  %s102_s13 = int_to_ptr.vmem [resolvable:$true] %s101_s13 }
  0x29   :  { %v73_v4 = vmul.f32 %v71_v2, %v69_v0  ;;  %v75_v5 = vadd.f32 %v71_v2, %v69_v0  ;;  %v74_v6 = vmul.f32 %v72_v3, %v70_v1  ;;  %v76_v7 = vadd.f32 %v72_v3, %v70_v1  ;;  %s170_s1 = scalar_lea.vmem %s92_s11, 128  ;;  %p175_p3 = scmp.lt.s32.totalorder %s92_s11, %s92_s11 }
  0x2a   :  { %p171_p2 = scmp.ne.s32.totalorder %s92_s11, %s170_s1  ;;  %p176_p4 = scmp.lt.s32.totalorder %s170_s1, %s170_s1 }
  0x2b   :  { %v77_v8 = vadd.f32 %v74_v6, %v73_v4  ;;  %v78_v9 = vadd.f32 %v76_v7, %v75_v5 }
  0x2c   :  { %p177_p5 = por %p176_p4, %p175_p3 }
  0x2d   :  { %81 = vst [vmem:[#allocation7] sm:$0xff] %v77_v8  ;;  %84 = vst [vmem:[#allocation8] sm:$0xff] %v78_v9 }
  0x2e   :  { %p178_p6 = pnand %p177_p5, %p171_p2 }
  0x30   :  { %181 = shalt.err (!%p178_p6)
}
  0x31   :  { %s182_s16 = scalar_lea.hbm %s298_s2, 128 }
  0x32   :  { %p183_p7 = scmp.ne.s32.totalorder %s298_s2, %s182_s16  ;;  %p186_p8 = scmp.lt.u32.totalorder %s182_s16, %s298_s2 }
  0x34   :  { %p188_p9 = pnand %p186_p8, %p183_p7 }
  0x36   :  { %191 = shalt.err (!%p188_p9)
}
  0x37   :  { %94 = dma.vmem_to_hbm [thread:$0]  %s92_s11, 128, %s298_s2, [#allocation4]  }
  0x38   :  { %s192_s23 = scalar_lea.vmem %s102_s13, 128  ;;  %p197_p11 = scmp.lt.s32.totalorder %s102_s13, %s102_s13 }
  0x39   :  { %p193_p10 = scmp.ne.s32.totalorder %s102_s13, %s192_s23  ;;  %p198_p12 = scmp.lt.s32.totalorder %s192_s23, %s192_s23 }
  0x3b   :  { %p199_p13 = por %p198_p12, %p197_p11 }
  0x3d   :  { %p200_p0 = pnand %p199_p13, %p193_p10 }
  0x3f   :  { %203 = shalt.err (!%p200_p0)
}
  0x40   :  { %s204_s26 = scalar_lea.hbm %s299_s3, 128 }
  0x41   :  { %p205_p1 = scmp.ne.s32.totalorder %s299_s3, %s204_s26  ;;  %p208_p2 = scmp.lt.u32.totalorder %s204_s26, %s299_s3 }
  0x43   :  { %p210_p3 = pnand %p208_p2, %p205_p1 }
  0x45   :  { %213 = shalt.err (!%p210_p3)
}
  0x46   :  { %104 = dma.vmem_to_hbm [thread:$0]  %s102_s13, 128, %s299_s3, [#allocation9]  }
  0x47   :  { %218 = dma.done.wait [#allocation4], 128  }
  0x48   :  { %219 = vsyncadd [#allocation4], 4294967168 }
  0x49   :  { %220 = dma.done.wait [#allocation9], 128  }
  0x4a   :  { %221 = vsyncadd [#allocation9], 4294967168 }
  0x4b   :  { %111 = vsyncpa [#allocation3], 1 }
  0x4c   :  { %112 = vsyncpa [#allocation6], 1 }
  0x4d   :  { %113 = vsyncpa [#allocation4], 1 }
  0x4e   :  { %114 = vsyncpa [#allocation9], 1 }

</bundles_post_ra>
